<compile_context>
chip_gen: v7x
topology: tpu7x:2x2x1
jax: 0.10.0
libtpu: 0.0.40
codegen_flags: <defaults>
</compile_context>

<pallas_src>
import functools

import jax
import jax.numpy as jnp
from jax.experimental import pallas as pl
from jax.experimental.pallas import tpu as pltpu


def _round_up(n: int, m: int) -> int:
    return (n + m - 1) // m * m


def _divisors_desc(n: int):
    return [d for d in range(n, 0, -1) if n % d == 0]


def _largest_divisor_tile(total: int, grain: int, target: int) -> int:
    """Largest multiple of `grain` dividing `total` (a multiple of grain) <= target."""
    units = total // grain
    target_units = max(1, target // grain)
    for d in _divisors_desc(units):
        if d <= target_units:
            return d * grain
    return grain


def _hw_config():
    """Returns (vmem_capacity_bytes, target_batch_tile_rows, use_bf16_activation)."""
    kind = ""
    try:
        kind = jax.devices()[0].device_kind.lower()
    except Exception:
        pass
    old_gen = any(t in kind for t in ("v2", "v3", "v4", "v5"))
    try:
        vmem_cap = int(pltpu.get_tpu_info().vmem_capacity_bytes)
    except Exception:
        if not kind:
            vmem_cap = 64 * 1024 * 1024              # unknown: assume tightest (v7x)
        elif "7" in kind:
            vmem_cap = 64 * 1024 * 1024              # v7x: 64 MiB per TC
        else:
            vmem_cap = 128 * 1024 * 1024             # v5e / v6e: 128 MiB
    if "v6" in kind:
        target_tb = 1024                             # v6e ridge ~700 FLOP/B
    else:
        target_tb = 512                              # v5e (~240 FLOP/B) / v7x / default
    use_bf16_act = bool(kind) and not old_gen        # bf16 EUP/VPU only on v6e/v7x
    return vmem_cap, target_tb, use_bf16_act


def _ffn_body(x_ref, w1_ref, b1_ref, w2_ref, b2_ref, out_ref, acc_ref, act_dtype):
    k = pl.program_id(2)

    @pl.when(k == 0)
    def _():
        acc_ref[...] = jnp.zeros_like(acc_ref)

    # fc1 on the MXU: (tile_b, K) @ (K, tile_h) -> f32 accumulate
    h = jnp.dot(x_ref[...], w1_ref[...], preferred_element_type=jnp.float32)
    h = h + b1_ref[...]                       # (1, tile_h) f32 bias broadcast
    # tanh on the EUP; bf16 on v6e/v7x (2x throughput, half the temp footprint),
    # f32 on v5e (no bf16 EUP/VPU there).
    t = jnp.tanh(h.astype(act_dtype))
    # fc2 partial sum over this hidden tile: (tile_b, tile_h) @ (tile_h, tile_n)
    acc_ref[...] += jnp.dot(t.astype(w2_ref.dtype), w2_ref[...],
                            preferred_element_type=jnp.float32)

    @pl.when(k == pl.num_programs(2) - 1)
    def _():
        out_ref[...] = (acc_ref[...] + b2_ref[...]).astype(out_ref.dtype)


def _make_kernel(act_dtype, use_scratch):
    if use_scratch:
        def kernel(x_ref, w1_ref, b1_ref, w2_ref, b2_ref, out_ref, acc_ref):
            _ffn_body(x_ref, w1_ref, b1_ref, w2_ref, b2_ref, out_ref, acc_ref, act_dtype)
    else:
        # f32 output: accumulate directly into the resident output block.
        def kernel(x_ref, w1_ref, b1_ref, w2_ref, b2_ref, out_ref):
            _ffn_body(x_ref, w1_ref, b1_ref, w2_ref, b2_ref, out_ref, out_ref, act_dtype)
    return kernel


@jax.jit
def feedforward(x, w1, b1, w2, b2):
    """x: (B, input); w1: (input, hidden); b1: (1, hidden);
    w2: (hidden, output); b2: (1, output)  ->  (B, output)."""
    B, K = x.shape
    H = w1.shape[1]
    N = w2.shape[1]
    out_dtype = x.dtype
    out_bytes = jnp.dtype(out_dtype).itemsize
    is_f32_out = jnp.dtype(out_dtype) == jnp.dtype(jnp.float32)

    vmem_cap, target_tb, bf16_act = _hw_config()
    block_budget = int(vmem_cap * 0.70)       # budget for pipelined blocks + acc
    vmem_limit = int(vmem_cap * 0.85)         # scoped limit, headroom for compiler

    # ---- minimal padding only ----------------------------------------------
    # K stays unpadded: x / W1 blocks span the full contraction dim (the
    # (8,128) rule allows block dim == full array dim).
    B_pad = _round_up(B, 8)
    H_pad = _round_up(H, 128)
    N_pad = _round_up(N, 128)                 # lane-dense output (>=128 wide)

    # ---- tile selection (all tiles are exact divisors -> zero dead work) ---
    tile_n = _largest_divisor_tile(N_pad, 128, 2048)

    tb_target = target_tb
    if B_pad >= 2 * 256:                      # keep >=2 batch tiles when B is large
        tb_target = min(tb_target, B_pad // 2)   # (v7x megacore shards this axis)
    tb_candidates = [d * 8 for d in _divisors_desc(B_pad // 8)
                     if d * 8 <= max(8, tb_target)]
    th_candidates = [d * 128 for d in _divisors_desc(H_pad // 128)]

    def fits(tb, th, tn):
        x_buf = 2 * tb * K * 2                # bf16 x tile, double-buffered
        w1_buf = 2 * K * th * 2               # bf16 W1 block
        w2_buf = 2 * th * tn * 2              # bf16 W2 block
        b_buf = 2 * (th + tn) * 4             # f32 bias slices
        out_buf = 2 * tb * tn * out_bytes     # output tile
        acc_buf = 0 if is_f32_out else tb * tn * 4
        act_buf = tb * th * 8                 # h/t temporaries headroom
        return (x_buf + w1_buf + w2_buf + b_buf + out_buf + acc_buf + act_buf
                ) <= block_budget

    tile_b = tile_h = None
    for th in th_candidates:                  # prefer tile_h == H_pad: weights resident
        for tb in tb_candidates:              # then the largest batch tile that fits
            if fits(tb, th, tile_n):
                tile_h, tile_b = th, tb
                break
        if tile_h is not None:
            break
    if tile_h is None:
        # TODO(synk): add a K-tiling grid axis (separate fc1 accumulator) for inputs
        # so wide that even the minimal (8, K) x-tile exceeds the VMEM budget.
        tile_h, tile_b = 128, 8

    grid = (B_pad // tile_b, N_pad // tile_n, H_pad // tile_h)

    def pad2(a, rows, cols):
        return jnp.pad(a, ((0, rows - a.shape[0]), (0, cols - a.shape[1])))

    # bf16 operands for the MXU; biases stay f32 and are added post-accumulation.
    xp = pad2(x, B_pad, K).astype(jnp.bfloat16)
    w1p = pad2(w1, K, H_pad).astype(jnp.bfloat16)
    b1p = pad2(b1, 1, H_pad).astype(jnp.float32)
    w2p = pad2(w2, H_pad, N_pad).astype(jnp.bfloat16)
    b2p = pad2(b2, 1, N_pad).astype(jnp.float32)

    act_dtype = jnp.bfloat16 if bf16_act else jnp.float32
    use_scratch = not is_f32_out
    scratch_shapes = ([pltpu.VMEM((tile_b, tile_n), jnp.float32)]
                      if use_scratch else [])

    out_padded = pl.pallas_call(
        _make_kernel(act_dtype, use_scratch),
        out_shape=jax.ShapeDtypeStruct((B_pad, N_pad), out_dtype),
        grid_spec=pltpu.PrefetchScalarGridSpec(
            num_scalar_prefetch=0,
            grid=grid,
            in_specs=[
                # x tile: new batch row-block per i, constant across j, k
                pl.BlockSpec((tile_b, K), lambda i, j, k: (i, 0)),
                # W1 column-block per hidden tile (constant -> resident when tile_h==H_pad)
                pl.BlockSpec((K, tile_h), lambda i, j, k: (0, k)),
                # b1 slice for this hidden tile
                pl.BlockSpec((1, tile_h), lambda i, j, k: (0, k)),
                # W2 block per (hidden tile, output tile)
                pl.BlockSpec((tile_h, tile_n), lambda i, j, k: (k, j)),
                # b2 slice for this output tile
                pl.BlockSpec((1, tile_n), lambda i, j, k: (0, j)),
            ],
            # Output block fixed across the hidden (reduction) axis -> resident
            # accumulator target; lane-dense last dim (multiple of 128).
            out_specs=pl.BlockSpec((tile_b, tile_n), lambda i, j, k: (i, j)),
            scratch_shapes=scratch_shapes,
        ),
        compiler_params=pltpu.CompilerParams(
            dimension_semantics=("parallel", "parallel", "arbitrary"),
            vmem_limit_bytes=vmem_limit,
        ),
    )(xp, w1p, b1p, w2p, b2p)

    return out_padded[:B, :N]


def init_params(key, input_size, hidden_size, output_size):
    # Deterministic init mimicking torch.nn.Linear's U(-1/sqrt(fan_in), ...).
    k1, k2, k3, k4 = jax.random.split(key, 4)
    bound1 = 1.0 / jnp.sqrt(input_size)
    bound2 = 1.0 / jnp.sqrt(hidden_size)
    w1 = jax.random.uniform(k1, (input_size, hidden_size), jnp.float32, -bound1, bound1)
    b1 = jax.random.uniform(k2, (1, hidden_size), jnp.float32, -bound1, bound1)
    w2 = jax.random.uniform(k3, (hidden_size, output_size), jnp.float32, -bound2, bound2)
    b2 = jax.random.uniform(k4, (1, output_size), jnp.float32, -bound2, bound2)
    return w1, b1, w2, b2


if __name__ == "__main__":
    key = jax.random.PRNGKey(0)
    kx, kp = jax.random.split(key)

    batch = 8
    input_size = 32
    hidden_size = 64
    output_size = 16

    x = jax.random.normal(kx, (batch, input_size), jnp.float32)
    w1, b1, w2, b2 = init_params(kp, input_size, hidden_size, output_size)

    out = feedforward(x, w1, b1, w2, b2)
    jax.block_until_ready(out)
    assert out.shape == (batch, output_size)

    # Pure-f32 reference (semantics check; loose tolerance for bf16 MXU operands
    # and the possibly-bf16 tanh path on v6e/v7x).
    ref_f32 = jnp.tanh(x @ w1 + b1) @ w2 + b2
    assert jnp.allclose(out, ref_f32, atol=5e-2, rtol=5e-2)

    print("KERNEL_OK")
</pallas_src>

<mosaic_0001>
module attributes {stable_mosaic.version = 11 : i64} {
  func.func @kernel(%arg0: i32, %arg1: i32, %arg2: i32, %arg3: memref<8x32xbf16, #tpu.memory_space<vmem>>, %arg4: memref<32x128xbf16, #tpu.memory_space<vmem>>, %arg5: memref<1x128xf32, #tpu.memory_space<vmem>>, %arg6: memref<128x128xbf16, #tpu.memory_space<vmem>>, %arg7: memref<1x128xf32, #tpu.memory_space<vmem>>, %arg8: memref<8x128xf32, #tpu.memory_space<vmem>>) attributes {dimension_semantics = [#tpu.dimension_semantics<parallel>, #tpu.dimension_semantics<parallel>, #tpu.dimension_semantics<arbitrary>], iteration_bounds = array<i64: 1, 1, 1>, scalar_prefetch = 0 : i64, scratch_operands = 0 : i64, tpu.core_type = #tpu.core_type<tc>, window_params = [{transform_indices = @transform_0, window_bounds = array<i64: 8, 32>}, {transform_indices = @transform_1, window_bounds = array<i64: 32, 128>}, {transform_indices = @transform_2, window_bounds = array<i64: 1, 128>}, {transform_indices = @transform_3, window_bounds = array<i64: 128, 128>}, {transform_indices = @transform_4, window_bounds = array<i64: 1, 128>}, {transform_indices = @transform_5, window_bounds = array<i64: 8, 128>}]} {
    %c0_i32 = arith.constant 0 : i32
    %0 = arith.cmpi eq, %arg2, %c0_i32 : i32
    %1 = arith.extui %0 : i1 to i32
    %c0_i32_0 = arith.constant 0 : i32
    %2 = arith.cmpi ne, %1, %c0_i32_0 : i32
    scf.if %2 {
      %cst_15 = arith.constant 0.000000e+00 : f32
      %19 = vector.broadcast %cst_15 : f32 to vector<8x128xf32>
      %c0_16 = arith.constant 0 : index
      %c0_17 = arith.constant 0 : index
      %20 = vector.load %arg8[%c0_16, %c0_17] : memref<8x128xf32, #tpu.memory_space<vmem>>, vector<8x128xf32>
      tpu.vector_store %arg8[%c0_16, %c0_17], %19 {strides = array<i32>} : memref<8x128xf32, #tpu.memory_space<vmem>>, vector<8x128xf32>,
    } else {
    }
    %c0 = arith.constant 0 : index
    %c0_1 = arith.constant 0 : index
    %3 = vector.load %arg3[%c0, %c0_1] : memref<8x32xbf16, #tpu.memory_space<vmem>>, vector<8x32xbf16>
    %c0_2 = arith.constant 0 : index
    %c0_3 = arith.constant 0 : index
    %4 = vector.load %arg4[%c0_2, %c0_3] : memref<32x128xbf16, #tpu.memory_space<vmem>>, vector<32x128xbf16>
    %cst = arith.constant dense<0.000000e+00> : vector<8x128xf32>
    %5 = tpu.matmul %3, %4, %cst {dimension_numbers = #tpu.dot_dimension_numbers<[1], [0], [0], [1], [0, 0, 1, 1], [], []>} : vector<8x32xbf16>, vector<32x128xbf16>, vector<8x128xf32> -> vector<8x128xf32>
    %c0_4 = arith.constant 0 : index
    %c0_5 = arith.constant 0 : index
    %6 = vector.load %arg5[%c0_4, %c0_5] : memref<1x128xf32, #tpu.memory_space<vmem>>, vector<1x128xf32>
    %7 = vector.broadcast %6 : vector<1x128xf32> to vector<8x128xf32>
    %8 = arith.addf %5, %7 : vector<8x128xf32>
    %9 = arith.truncf %8 : vector<8x128xf32> to vector<8x128xbf16>
    %10 = math.tanh %9 : vector<8x128xbf16>
    %c0_6 = arith.constant 0 : index
    %c0_7 = arith.constant 0 : index
    %11 = vector.load %arg8[%c0_6, %c0_7] : memref<8x128xf32, #tpu.memory_space<vmem>>, vector<8x128xf32>
    %c0_8 = arith.constant 0 : index
    %c0_9 = arith.constant 0 : index
    %12 = vector.load %arg6[%c0_8, %c0_9] : memref<128x128xbf16, #tpu.memory_space<vmem>>, vector<128x128xbf16>
    %cst_10 = arith.constant dense<0.000000e+00> : vector<8x128xf32>
    %13 = tpu.matmul %10, %12, %cst_10 {dimension_numbers = #tpu.dot_dimension_numbers<[1], [0], [0], [1], [0, 0, 1, 1], [], []>} : vector<8x128xbf16>, vector<128x128xbf16>, vector<8x128xf32> -> vector<8x128xf32>
    %14 = arith.addf %11, %13 : vector<8x128xf32>
    %c0_11 = arith.constant 0 : index
    %c0_12 = arith.constant 0 : index
    %15 = vector.load %arg8[%c0_11, %c0_12] : memref<8x128xf32, #tpu.memory_space<vmem>>, vector<8x128xf32>
    tpu.vector_store %arg8[%c0_11, %c0_12], %14 {strides = array<i32>} : memref<8x128xf32, #tpu.memory_space<vmem>>, vector<8x128xf32>,
    %c0_i32_13 = arith.constant 0 : i32
    %16 = arith.cmpi eq, %arg2, %c0_i32_13 : i32
    %17 = arith.extui %16 : i1 to i32
    %c0_i32_14 = arith.constant 0 : i32
    %18 = arith.cmpi ne, %17, %c0_i32_14 : i32
    scf.if %18 {
      %c0_15 = arith.constant 0 : index
      %c0_16 = arith.constant 0 : index
      %19 = vector.load %arg8[%c0_15, %c0_16] : memref<8x128xf32, #tpu.memory_space<vmem>>, vector<8x128xf32>
      %c0_17 = arith.constant 0 : index
      %c0_18 = arith.constant 0 : index
      %20 = vector.load %arg7[%c0_17, %c0_18] : memref<1x128xf32, #tpu.memory_space<vmem>>, vector<1x128xf32>
      %21 = vector.broadcast %20 : vector<1x128xf32> to vector<8x128xf32>
      %22 = arith.addf %19, %21 : vector<8x128xf32>
      %c0_19 = arith.constant 0 : index
      %c0_20 = arith.constant 0 : index
      %23 = vector.load %arg8[%c0_19, %c0_20] : memref<8x128xf32, #tpu.memory_space<vmem>>, vector<8x128xf32>
      tpu.vector_store %arg8[%c0_19, %c0_20], %22 {strides = array<i32>} : memref<8x128xf32, #tpu.memory_space<vmem>>, vector<8x128xf32>,
    } else {
    }
    return
  }
  func.func @transform_0(%arg0: i32, %arg1: i32, %arg2: i32) -> (i32, i32) {
    %c0_i32 = arith.constant 0 : i32
    %c0_i32_0 = arith.constant 0 : i32
    return %arg0, %c0_i32 : i32, i32
  }
  func.func @transform_1(%arg0: i32, %arg1: i32, %arg2: i32) -> (i32, i32) {
    %c0_i32 = arith.constant 0 : i32
    %c0_i32_0 = arith.constant 0 : i32
    return %c0_i32, %arg2 : i32, i32
  }
  func.func @transform_2(%arg0: i32, %arg1: i32, %arg2: i32) -> (i32, i32) {
    %c0_i32 = arith.constant 0 : i32
    %c0_i32_0 = arith.constant 0 : i32
    return %c0_i32, %arg2 : i32, i32
  }
  func.func @transform_3(%arg0: i32, %arg1: i32, %arg2: i32) -> (i32, i32) {
    %c0_i32 = arith.constant 0 : i32
    return %arg2, %arg1 : i32, i32
  }
  func.func @transform_4(%arg0: i32, %arg1: i32, %arg2: i32) -> (i32, i32) {
    %c0_i32 = arith.constant 0 : i32
    %c0_i32_0 = arith.constant 0 : i32
    return %c0_i32, %arg1 : i32, i32
  }
  func.func @transform_5(%arg0: i32, %arg1: i32, %arg2: i32) -> (i32, i32) {
    %c0_i32 = arith.constant 0 : i32
    return %arg0, %arg1 : i32, i32
  }
}

</mosaic_0001>

<bundles_post_ra>
// kernel: feedforward.1
= control target key start
LH: loop header
LB: loop body
LE: loop exit
PB: predicated region body
PF: predicated region fallthrough
CT: control target
= control target key end

     0   :  { %10 = vsyncpa [#allocation3], 0  ;;  %s623_s0 = inlined_call_operand.hbm [shape: bf16[8,32], index: 0, kind: input, shape index: {}]   ;;  %s624_s1 = inlined_call_operand.hbm [shape: bf16[32,128], index: 1, kind: input, shape index: {}]   ;;  %s625_s2 = inlined_call_operand.hbm [shape: f32[1,128], index: 2, kind: input, shape index: {}]   ;;  %s626_s3 = inlined_call_operand.hbm [shape: bf16[128,128], index: 3, kind: input, shape index: {}]   ;;  %s627_s4 = inlined_call_operand.hbm [shape: f32[1,128], index: 4, kind: input, shape index: {}]   ;;  %s628_s5 = inlined_call_operand.hbm [shape: f32[8,128], index: 5, kind: output, shape index: {}]  }
   0x1   :  { %11 = vsyncpa [#allocation6], 0 }
   0x2   :  { %12 = vsyncpa [#allocation9], 0 }
   0x3   :  { %13 = vsyncpa [#allocation4], 0  ;;  %s511_s18 = smov [#allocation5]   ;;  %s371_s22 = scalar_lea.hbm %s624_s1, 256 }
   0x4   :  { %s29_s19 = sshll.u32 %s511_s18, 4  ;;  %p372_p0 = scmp.ne.s32.totalorder %s624_s1, %s371_s22  ;;  %s30_s19 = int_to_ptr.vmem [resolvable:$true] %s29_s19 }
   0x5   :  { %p375_p1 = scmp.lt.u32.totalorder %s371_s22, %s624_s1 }
   0x7   :  { %p377_p2 = pnand %p375_p1, %p372_p0 }
   0x9   :  { %380 = shalt.err (!%p377_p2)
}
   0xa   :  { %s381_s27 = scalar_lea.vmem %s30_s19, 256  ;;  %p386_p4 = scmp.lt.s32.totalorder %s30_s19, %s30_s19 }
   0xb   :  { %p382_p3 = scmp.ne.s32.totalorder %s30_s19, %s381_s27  ;;  %p387_p5 = scmp.lt.s32.totalorder %s381_s27, %s381_s27 }
   0xd   :  { %p388_p6 = por %p387_p5, %p386_p4 }
   0xf   :  { %p389_p7 = pnand %p388_p6, %p382_p3 }
  0x11   :  { %392 = shalt.err (!%p389_p7)
}
  0x12   :  { %s512_s28 = smov 64   ;;  %s513_s29 = smov 4  }
  0x13   :  { %35 = dma.hbm_to_vmem [thread:$0]  %s624_s1, 256, %s30_s19, [#allocation6], %s512_s28, %s512_s28, %s513_s29  }
  0x14   :  { %s514_s7 = smov [#allocation8]   ;;  %s515_s9 = smov [#allocation2]  }
  0x15   :  { %s51_s8 = sshll.u32 %s514_s7, 4  ;;  %s20_s10 = sshll.u32 %s515_s9, 4  ;;  %s52_s8 = int_to_ptr.vmem [resolvable:$true] %s51_s8  ;;  %s21_s10 = int_to_ptr.vmem [resolvable:$true] %s20_s10 }
  0x16   :  { %s393_s13 = scalar_lea.hbm %s626_s3, 1024 }
  0x17   :  { %p394_p8 = scmp.ne.s32.totalorder %s626_s3, %s393_s13  ;;  %p397_p9 = scmp.lt.u32.totalorder %s393_s13, %s626_s3 }
  0x19   :  { %p399_p10 = pnand %p397_p9, %p394_p8 }
  0x1b   :  { %402 = shalt.err (!%p399_p10)
}
  0x1c   :  { %s403_s1 = scalar_lea.vmem %s52_s8, 1024  ;;  %p408_p12 = scmp.lt.s32.totalorder %s52_s8, %s52_s8 }
  0x1d   :  { %p404_p11 = scmp.ne.s32.totalorder %s52_s8, %s403_s1  ;;  %p409_p13 = scmp.lt.s32.totalorder %s403_s1, %s403_s1 }
  0x1f   :  { %p410_p0 = por %p409_p13, %p408_p12 }
  0x21   :  { %p411_p1 = pnand %p410_p0, %p404_p11 }
  0x23   :  { %414 = shalt.err (!%p411_p1)
}
  0x24   :  { %57 = dma.hbm_to_vmem [thread:$0]  %s626_s3, 1024, %s52_s8, [#allocation9], %s512_s28, %s512_s28, %s513_s29  }
  0x25   :  { %s415_s22 = scalar_lea.hbm %s623_s0, 64 }
  0x26   :  { %p416_p2 = scmp.ne.s32.totalorder %s623_s0, %s415_s22  ;;  %p419_p3 = scmp.lt.u32.totalorder %s415_s22, %s623_s0 }
  0x28   :  { %p421_p4 = pnand %p419_p3, %p416_p2 }
  0x2a   :  { %424 = shalt.err (!%p421_p4)
}
  0x2b   :  { %s425_s27 = scalar_lea.vmem %s21_s10, 64  ;;  %p430_p6 = scmp.lt.s32.totalorder %s21_s10, %s21_s10 }
  0x2c   :  { %p426_p5 = scmp.ne.s32.totalorder %s21_s10, %s425_s27  ;;  %p431_p7 = scmp.lt.s32.totalorder %s425_s27, %s425_s27 }
  0x2e   :  { %p432_p8 = por %p431_p7, %p430_p6 }
  0x30   :  { %p433_p9 = pnand %p432_p8, %p426_p5 }
  0x32   :  { %436 = shalt.err (!%p433_p9)
}
  0x33   :  { %23 = dma.hbm_to_vmem [thread:$0]  %s623_s0, 64, %s21_s10, [#allocation3]  }
  0x34   :  { %s516_s29 = smov [#allocation7]   ;;  %s517_s6 = smov [#allocation10]  }
  0x35   :  { %s42_s30 = sshll.u32 %s516_s29, 4  ;;  %s64_s7 = sshll.u32 %s517_s6, 4  ;;  %s43_s30 = int_to_ptr.vmem [resolvable:$true] %s42_s30  ;;  %s65_s7 = int_to_ptr.vmem [resolvable:$true] %s64_s7 }
  0x36   :  { %s437_s11 = scalar_lea.hbm %s625_s2, 16 }
  0x37   :  { %p438_p10 = scmp.ne.s32.totalorder %s625_s2, %s437_s11  ;;  %p441_p11 = scmp.lt.u32.totalorder %s437_s11, %s625_s2 }
  0x39   :  { %p443_p12 = pnand %p441_p11, %p438_p10 }
  0x3b   :  { %446 = shalt.err (!%p443_p12)
}
  0x3c   :  { %s447_s0 = scalar_lea.vmem %s43_s30, 16  ;;  %s451_s10 = scalar_lea.vmem %s43_s30, 32 }
  0x3d   :  { %p448_p13 = scmp.ne.s32.totalorder %s43_s30, %s447_s0  ;;  %p452_p0 = scmp.lt.s32.totalorder %s43_s30, %s43_s30 }
  0x3e   :  { %p453_p1 = scmp.lt.s32.totalorder %s451_s10, %s447_s0 }
  0x40   :  { %p454_p2 = por %p453_p1, %p452_p0 }
  0x42   :  { %p455_p3 = pnand %p454_p2, %p448_p13 }
  0x44   :  { %458 = shalt.err (!%p455_p3)
}
  0x45   :  { %45 = dma.hbm_to_vmem [thread:$0]  %s625_s2, 16, %s43_s30, [#allocation6]  }
  0x46   :  { %s459_s19 = scalar_lea.hbm %s627_s4, 16 }
  0x47   :  { %p460_p4 = scmp.ne.s32.totalorder %s627_s4, %s459_s19  ;;  %p463_p5 = scmp.lt.u32.totalorder %s459_s19, %s627_s4 }
  0x49   :  { %p465_p6 = pnand %p463_p5, %p460_p4 }
  0x4b   :  { %468 = shalt.err (!%p465_p6)
}
  0x4c   :  { %s469_s24 = scalar_lea.vmem %s65_s7, 16  ;;  %s473_s25 = scalar_lea.vmem %s65_s7, 32 }
  0x4d   :  { %p470_p7 = scmp.ne.s32.totalorder %s65_s7, %s469_s24  ;;  %p474_p8 = scmp.lt.s32.totalorder %s65_s7, %s65_s7 }
  0x4e   :  { %p475_p9 = scmp.lt.s32.totalorder %s473_s25, %s469_s24 }
  0x50   :  { %p476_p10 = por %p475_p9, %p474_p8 }
  0x52   :  { %p477_p11 = pnand %p476_p10, %p470_p7 }
  0x54   :  { %480 = shalt.err (!%p477_p11)
}
  0x55   :  { %67 = dma.hbm_to_vmem [thread:$0]  %s627_s4, 16, %s65_s7, [#allocation9]  }
  0x56   :  { %503 = dma.done.wait [#allocation3], 64  }
  0x57   :  { %504 = vsyncadd [#allocation3], 4294967232 }
  0x58   :  { %505 = dma.done.wait [#allocation6], 272  }
  0x59   :  { %506 = vsyncadd [#allocation6], 4294967024 }
  0x5a   :  { %507 = dma.done.wait [#allocation9], 1040  }
  0x5b   :  { %508 = vsyncadd [#allocation9], 4294966256  ;;  %v518_v0 = vmov 0.0   ;;  %vm519_vm0 = vmmov 0   ;;  %v359_v1 = vld [vmem:[#allocation5] sm:$0xff]   ;;  %v360_v2 = vld [vmem:[#allocation5 + $0x8] sm:$0xff]  }
  0x5c   :  { %321 = vmatprep.subr.bf16.mxu0 %v518_v0  ;;  %325 = vmatprep.mubr.msk.bf16.mxu0 %vm519_vm0, %v518_v0  ;;  %v361_v3 = vld [vmem:[#allocation8] sm:$0xff]   ;;  %v362_v4 = vld [vmem:[#allocation8 + $0x8] sm:$0xff]   ;;  %vm113_vm1 = vcmask 261120   ;;  %v363_v6 = vld [vmem:[#allocation8 + $0x10] sm:$0xff]   ;;  %s520_s4 = smov [#allocation11]  }
  0x5d   :  { %329 = vmatprep.subr.bf16.mxu1 %v518_v0  ;;  %345 = vmatprep.mubr.msk.bf16.mxu1 %vm519_vm0, %v518_v0  ;;  %v89_v5 = vld [vmem:[#allocation2] sm:$0xf]  ;;  %v364_v7 = vld [vmem:[#allocation8 + $0x18] sm:$0xff]   ;;  %v365_v8 = vld [vmem:[#allocation8 + $0x20] sm:$0xff]   ;;  %s285_s27 = sshll.u32 %s520_s4, 4  ;;  %s286_s27 = int_to_ptr.vmem [resolvable:$true] %s285_s27 }
  0x5e   :  { %322 = vmatpush3.bf16.msra.mxu0 %v359_v1  ;;  %330 = vmatpush3.bf16.msra.mxu1 %v361_v3  ;;  %v366_v9 = vld [vmem:[#allocation8 + $0x28] sm:$0xff]   ;;  %v367_v10 = vld [vmem:[#allocation8 + $0x30] sm:$0xff]   ;;  %v368_v11 = vld [vmem:[#allocation8 + $0x38] sm:$0xff]   ;;  %s481_s3 = scalar_lea.vmem %s286_s27, 128  ;;  %p486_p13 = scmp.lt.s32.totalorder %s286_s27, %s286_s27 }
  0x5f   :  { %323 = vmatprep.subr.bf16.mxu0 %v518_v0  ;;  %331 = vmatprep.subr.bf16.mxu1 %v518_v0  ;;  %v296_v12 = vld [vmem:[#allocation7] ss:$0 sm:$0xff]  ;;  %v308_v21 = vld [vmem:[#allocation10] ss:$0 sm:$0xff]  ;;  %p482_p12 = scmp.ne.s32.totalorder %s286_s27, %s481_s3  ;;  %p487_p0 = scmp.lt.s32.totalorder %s481_s3, %s481_s3 }
  0x61   :  { %p488_p1 = por %p487_p0, %p486_p13 }
  0x62   :  { %324 = vmatpush3.bf16.msra.mxu0 %v360_v2  ;;  %332 = vmatpush3.bf16.msra.mxu1 %v362_v4 }
  0x63   :  { %333 = vmatprep.subr.bf16.mxu1 %v518_v0  ;;  %p489_p2 = pnand %p488_p1, %p482_p12 }
  0x65   :  { %326 = vmatmul.mubr.msk.bf16.vlgmr.msra.gmra.mrb[0].mxu0 %vm113_vm1, %v89_v5 }
  0x66   :  { %334 = vmatpush3.bf16.msra.mxu1 %v363_v6 }
  0x67   :  { %335 = vmatprep.subr.bf16.mxu1 %v518_v0 }
  0x6a   :  { %336 = vmatpush3.bf16.msra.mxu1 %v364_v7 }
  0x6b   :  { %337 = vmatprep.subr.bf16.mxu1 %v518_v0 }
  0x6e   :  { %338 = vmatpush3.bf16.msra.mxu1 %v365_v8 }
  0x6f   :  { %339 = vmatprep.subr.bf16.mxu1 %v518_v0 }
  0x72   :  { %340 = vmatpush3.bf16.msra.mxu1 %v366_v9 }
  0x73   :  { %341 = vmatprep.subr.bf16.mxu1 %v518_v0 }
  0x76   :  { %342 = vmatpush3.bf16.msra.mxu1 %v367_v10 }
  0x77   :  { %343 = vmatprep.subr.bf16.mxu1 %v518_v0 }
  0x7a   :  { %344 = vmatpush3.bf16.msra.mxu1 %v368_v11 }
 0x138   :  { %v151_v13 = vpop.f32.mrb[0].mxu0 }
 0x139   :  { %v152_v14 = vadd.f32 %v296_v12, %v151_v13  ;;  %v327_v15 = vpop.f32.mrb[1].mxu0 }
 0x13a   :  { %v154_v16 = vpop.f32.mrb[2].mxu0 }
 0x13b   :  { %v157_v17 = vpack.c.bf16 %v152_v14, %v152_v14  ;;  %v328_v18 = vpop.f32.mrb[3].mxu0 }
 0x13d   :  { %369 = vtanh.bf16 %v157_v17 }
 0x148   :  { %v370_v19 = vpop.eup %369 }
 0x149   :  { %346 = vmatmul.mubr.bf16.vlgmr.msra.gmra.mrb[0].mxu1 %v370_v19 }
 0x21c   :  { %v258_v20 = vpop.f32.mrb[0].mxu1 }
 0x21d   :  { %v347_v22 = vpop.f32.mrb[1].mxu1  ;;  %v277_v25 = vadd.f32 %v308_v21, %v258_v20 }
 0x21e   :  { %v261_v23 = vpop.f32.mrb[2].mxu1 }
 0x21f   :  { %v348_v24 = vpop.f32.mrb[3].mxu1  ;;  %278 = vst [vmem:[#allocation11] sm:$0xff] %v277_v25 }
 0x220   :  { %492 = shalt.err (!%p489_p2)
}
 0x221   :  { %s493_s30 = scalar_lea.hbm %s628_s5, 128 }
 0x222   :  { %p494_p3 = scmp.ne.s32.totalorder %s628_s5, %s493_s30  ;;  %p497_p4 = scmp.lt.u32.totalorder %s493_s30, %s628_s5 }
 0x224   :  { %p499_p5 = pnand %p497_p4, %p494_p3 }
 0x226   :  { %502 = shalt.err (!%p499_p5)
}
 0x227   :  { %288 = dma.vmem_to_hbm [thread:$0]  %s286_s27, 128, %s628_s5, [#allocation4]  }
 0x228   :  { %509 = dma.done.wait [#allocation4], 128  }
 0x229   :  { %510 = vsyncadd [#allocation4], 4294967168 }
 0x22a   :  { %292 = vsyncpa [#allocation3], 1 }
 0x22b   :  { %293 = vsyncpa [#allocation6], 1 }
 0x22c   :  { %294 = vsyncpa [#allocation9], 1 }
 0x22d   :  { %295 = vsyncpa [#allocation4], 1 }

</bundles_post_ra>
